<compile_context>
chip_gen: v6e
topology: v6e:2x2x1
jax: 0.10.0
libtpu: 0.0.40
codegen_flags: <defaults>
</compile_context>

<pallas_src>
import jax
import jax.numpy as jnp
from jax import lax
from jax.experimental import pallas as pl
from jax.experimental.pallas import tpu as pltpu


_NEG_BIG = -1e30  # finite "minus infinity" (keeps 0 * sentinel and exp(sentinel - m) finite)


def _round_up(x: int, m: int) -> int:
    return ((x + m - 1) // m) * m


def _split_tiles(total: int, max_tile: int, align: int, force_two: bool):
    """Pick (tile, padded_total, num_tiles) with tile % align == 0 and minimal padding."""
    t = min(int(max_tile), _round_up(total, align))
    n = -(-total // t)
    if force_two and n < 2 and _round_up(total, align) > align:
        n = 2                      # ensure >= 2 parallel tiles (v7x: 2 TCs shard this axis)
    t = _round_up(-(-total // n), align)
    return t, t * n, n


def _make_supcon_kernel(temperature: float, base_temperature: float,
                        tile_a: int, tile_n: int,
                        use_label_mask: bool, has_pad_bias: bool):
    inv_temp = 1.0 / float(temperature)
    coeff = float(temperature) / float(base_temperature)

    def kernel(*refs):
        it = iter(refs)
        anchor_ref = next(it)                 # [TILE_A, D_pad]   (bf16 or f32)
        contrast_ref = next(it)               # [D_pad, TILE_N]   (pre-transposed)
        if use_label_mask:
            alab_ref = next(it)               # [TILE_A, 1] int32
            clab_ref = next(it)               # [1, TILE_N] int32
        else:
            mask_ref = next(it)               # [TILE_A, TILE_N] int8
        cnt_ref = next(it)                    # [TILE_A, 1] f32 (precomputed positive counts)
        bias_ref = next(it) if has_pad_bias else None   # [1, TILE_N] f32
        out_ref = next(it)                    # [TILE_A, 1] f32
        m_sc = next(it)                       # running max
        l_sc = next(it)                       # running denominator
        s_sc = next(it)                       # running sum(pos * sim)

        i = pl.program_id(0)                  # anchor-row tile   (parallel)
        j = pl.program_id(1)                  # contrast-col tile (reduction)

        @pl.when(j == 0)
        def _():
            m_sc[...] = jnp.full_like(m_sc, _NEG_BIG)
            l_sc[...] = jnp.zeros_like(l_sc)
            s_sc[...] = jnp.zeros_like(s_sc)

        # anchor @ contrast (natural (M,K)x(K,N), f32 accumulation on the MXU).
        sim = jnp.dot(anchor_ref[...], contrast_ref[...],
                      preferred_element_type=jnp.float32) * inv_temp   # [TILE_A, TILE_N]
        if has_pad_bias:
            sim = sim + bias_ref[...]         # padded contrast columns -> -1e30

        if use_label_mask:
            pos = (alab_ref[...] == clab_ref[...]).astype(jnp.float32)   # broadcast compare
        else:
            pos = mask_ref[...].astype(jnp.float32)

        # Self-diagonal handling only on tiles whose row range intersects the
        # column range (global self column == global row index).
        row_start = i * tile_a
        col_start = j * tile_n
        has_diag = jnp.logical_and(row_start < col_start + tile_n,
                                   col_start < row_start + tile_a)

        def _mask_diag(ops):
            s, p = ops
            rg = row_start + lax.broadcasted_iota(jnp.int32, (tile_a, tile_n), 0)
            cg = col_start + lax.broadcasted_iota(jnp.int32, (tile_a, tile_n), 1)
            self_m = rg == cg
            return (jnp.where(self_m, _NEG_BIG, s), jnp.where(self_m, 0.0, p))

        sim, pos = lax.cond(has_diag, _mask_diag, lambda ops: ops, (sim, pos))

        # Online (running) max + rescaled denominator (flash-style).
        m_prev = m_sc[...]
        m_new = jnp.maximum(m_prev, jnp.max(sim, axis=1, keepdims=True))
        alpha = jnp.exp(m_prev - m_new)
        p_exp = jnp.exp(sim - m_new)          # masked entries underflow to 0

        l_sc[...] = alpha * l_sc[...] + jnp.sum(p_exp, axis=1, keepdims=True)
        s_sc[...] = s_sc[...] + jnp.sum(pos * sim, axis=1, keepdims=True)
        m_sc[...] = m_new

        @pl.when(j == pl.num_programs(1) - 1)
        def _():
            # mean_log_prob_pos = sum(pos*sim)/count - (max + log(denominator))
            mlpp = s_sc[...] / cnt_ref[...] - m_sc[...] - jnp.log(l_sc[...])
            out_ref[...] = (-coeff) * mlpp

    return kernel


def supcon_loss(features, labels=None, mask=None,
                temperature=0.07, contrast_mode='all', base_temperature=0.07,
                tile_a=1024, tile_n=512, compute_dtype=jnp.bfloat16):
    """JAX/Pallas equivalent of SupConLoss.forward (returns a scalar loss)."""
    if features.ndim < 3:
        raise ValueError('`features` needs to be [bsz, n_views, ...]')
    if features.ndim > 3:
        features = features.reshape(features.shape[0], features.shape[1], -1)
    features = features.astype(jnp.float32)
    batch_size, n_views, dim = features.shape

    if labels is not None and mask is not None:
        raise ValueError('Cannot define both `labels` and `mask`')
    use_label_mask = mask is None
    if labels is None and mask is None:
        labels = jnp.arange(batch_size, dtype=jnp.int32)   # SimCLR: eye mask via labels
    if labels is not None:
        labels = jnp.asarray(labels).reshape(-1).astype(jnp.int32)
        if labels.shape[0] != batch_size:
            raise ValueError('Num of labels does not match num of features')

    contrast_count = n_views
    # torch.cat(torch.unbind(features, 1), 0): view0 batch, view1 batch, ...
    contrast_feature = jnp.transpose(features, (1, 0, 2)).reshape(
        batch_size * contrast_count, dim)

    if contrast_mode == 'one':
        anchor_feature = features[:, 0]
        anchor_count = 1
    elif contrast_mode == 'all':
        anchor_feature = contrast_feature
        anchor_count = contrast_count
    else:
        raise ValueError('Unknown mode: {}'.format(contrast_mode))

    A = batch_size * anchor_count
    N = batch_size * contrast_count
    D_pad = _round_up(dim, 128)

    TILE_A, A_pad, _ = _split_tiles(A, tile_a, 8, force_two=True)
    TILE_N, N_pad, _ = _split_tiles(N, tile_n, 128, force_two=False)
    grid = (A_pad // TILE_A, N_pad // TILE_N)

    itemsize = jnp.dtype(compute_dtype).itemsize
    anchor_p = jnp.pad(anchor_feature,
                       ((0, A_pad - A), (0, D_pad - dim))).astype(compute_dtype)
    contrast_t = jnp.pad(contrast_feature,
                         ((0, N_pad - N), (0, D_pad - dim))).astype(compute_dtype).T  # [D_pad, N_pad]

    in_specs = [
        pl.BlockSpec((TILE_A, D_pad), lambda i, j: (i, 0)),
        pl.BlockSpec((D_pad, TILE_N), lambda i, j: (0, j)),
    ]
    inputs = [anchor_p, contrast_t]

    if use_label_mask:
        a_lab_full = jnp.tile(labels, anchor_count)                 # [A]
        c_lab_full = jnp.tile(labels, contrast_count)               # [N]
        cnt = ((a_lab_full[:, None] == c_lab_full[None, :]).sum(axis=1)
               .astype(jnp.float32) - 1.0)                          # positives excl. self
        a_lab = jnp.pad(a_lab_full, (0, A_pad - A), constant_values=-1).reshape(A_pad, 1)
        c_lab = jnp.pad(c_lab_full, (0, N_pad - N), constant_values=-2).reshape(1, N_pad)
        in_specs += [pl.BlockSpec((TILE_A, 1), lambda i, j: (i, 0)),
                     pl.BlockSpec((1, TILE_N), lambda i, j: (0, j))]
        inputs += [a_lab, c_lab]
        mask_bytes = (A_pad + N_pad) * 4
    else:
        # TODO(synk): arbitrary user masks cannot be factored into per-row/col labels,
        # so this (rare) path still streams the tiled [A, N] mask — as int8 (binary
        # masks assumed, as in the PyTorch spec).
        mask = jnp.asarray(mask, jnp.float32)
        mask_tiled = jnp.tile(mask, (anchor_count, contrast_count))  # [A, N]
        cnt = mask_tiled.sum(axis=1) - mask_tiled[jnp.arange(A), jnp.arange(A)]
        mask_p = jnp.pad(mask_tiled, ((0, A_pad - A), (0, N_pad - N))).astype(jnp.int8)
        in_specs += [pl.BlockSpec((TILE_A, TILE_N), lambda i, j: (i, j))]
        inputs += [mask_p]
        mask_bytes = A_pad * N_pad

    # Precomputed positive counts (padded rows -> 1.0 to avoid div-by-zero; they are
    # sliced off before the mean). Zero-positive valid anchors give NaN exactly like
    # the PyTorch reference.
    cnt_p = jnp.pad(cnt, (0, A_pad - A), constant_values=1.0).reshape(A_pad, 1)
    in_specs += [pl.BlockSpec((TILE_A, 1), lambda i, j: (i, 0))]
    inputs += [cnt_p]

    has_pad_bias = (N_pad != N)
    if has_pad_bias:
        bias = jnp.where(jnp.arange(N_pad) < N, 0.0, _NEG_BIG).astype(jnp.float32)
        in_specs += [pl.BlockSpec((1, TILE_N), lambda i, j: (0, j))]
        inputs += [bias.reshape(1, N_pad)]

    out_spec = pl.BlockSpec((TILE_A, 1), lambda i, j: (i, 0))
    out_shape = jax.ShapeDtypeStruct((A_pad, 1), jnp.float32)

    scratch_shapes = [pltpu.VMEM((TILE_A, 1), jnp.float32),   # running max
                      pltpu.VMEM((TILE_A, 1), jnp.float32),   # running denominator
                      pltpu.VMEM((TILE_A, 1), jnp.float32)]   # sum(pos * sim)

    kernel = _make_supcon_kernel(temperature, base_temperature,
                                 tile_a=TILE_A, tile_n=TILE_N,
                                 use_label_mask=use_label_mask,
                                 has_pad_bias=has_pad_bias)

    # VMEM budget: physical capacity (per generation) minus headroom; tile-sized
    # live intermediates (~5x) + double-buffered feature/mask tiles.
    try:
        phys_vmem = int(pltpu.get_tpu_info().vmem_capacity_bytes)
    except Exception:
        phys_vmem = 64 * 1024 * 1024
    vmem_cap = (phys_vmem * 3) // 4
    vmem_est = (5 * TILE_A * TILE_N * 4
                + 4 * (TILE_A + TILE_N) * D_pad * itemsize
                + (0 if use_label_mask else 2 * TILE_A * TILE_N)
                + 32 * (TILE_A + TILE_N) * 4)
    vmem_limit = int(min(max(vmem_est, 16 * 1024 * 1024), vmem_cap))

    cost = pl.CostEstimate(
        flops=int(2 * A_pad * N_pad * D_pad + 10 * A_pad * N_pad),
        transcendentals=int(A_pad * N_pad + 2 * A_pad * grid[1]),
        bytes_accessed=int(A_pad * D_pad * itemsize
                           + grid[0] * N_pad * D_pad * itemsize
                           + mask_bytes + A_pad * 8))

    out = pl.pallas_call(
        kernel,
        out_shape=out_shape,
        grid_spec=pltpu.PrefetchScalarGridSpec(
            num_scalar_prefetch=0,
            grid=grid,
            in_specs=in_specs,
            out_specs=out_spec,
            scratch_shapes=scratch_shapes),
        compiler_params=pltpu.CompilerParams(
            dimension_semantics=("parallel", "arbitrary"),
            vmem_limit_bytes=vmem_limit),
        cost_estimate=cost,
    )(*inputs)

    # loss.view(anchor_count, batch_size).mean() == mean over all A anchors.
    return jnp.mean(out[:A, 0])


def _supcon_loss_ref(features, labels=None, mask=None, temperature=0.07,
                     contrast_mode='all', base_temperature=0.07):
    """Plain-JAX reference mirroring the PyTorch code."""
    features = features.astype(jnp.float32)
    bsz, n_views, dim = features.shape
    if labels is None and mask is None:
        mask = jnp.eye(bsz, dtype=jnp.float32)
    elif labels is not None:
        labels = labels.reshape(-1, 1)
        mask = (labels == labels.T).astype(jnp.float32)
    else:
        mask = mask.astype(jnp.float32)
    contrast_count = n_views
    contrast_feature = jnp.transpose(features, (1, 0, 2)).reshape(bsz * n_views, dim)
    if contrast_mode == 'one':
        anchor_feature = features[:, 0]
        anchor_count = 1
    else:
        anchor_feature = contrast_feature
        anchor_count = contrast_count
    A = bsz * anchor_count
    adc = jnp.matmul(anchor_feature, contrast_feature.T) / temperature
    logits = adc - jnp.max(adc, axis=1, keepdims=True)
    mask = jnp.tile(mask, (anchor_count, contrast_count))
    logits_mask = jnp.ones_like(mask).at[jnp.arange(A), jnp.arange(A)].set(0.0)
    mask = mask * logits_mask
    exp_logits = jnp.exp(logits) * logits_mask
    log_prob = logits - jnp.log(exp_logits.sum(1, keepdims=True))
    mean_log_prob_pos = (mask * log_prob).sum(1) / mask.sum(1)
    loss = -(temperature / base_temperature) * mean_log_prob_pos
    return loss.reshape(anchor_count, bsz).mean()


if __name__ == "__main__":
    key = jax.random.PRNGKey(0)
    k1, k2, k3, k4 = jax.random.split(key, 4)

    # --- small case: bsz=8, n_views=2, dim=32 ---------------------------------
    bsz, n_views, dim = 8, 2, 32
    feats = jax.random.normal(k1, (bsz, n_views, dim), dtype=jnp.float32)
    feats = feats / jnp.linalg.norm(feats, axis=-1, keepdims=True)
    labels = jax.random.randint(k2, (bsz,), 0, 3)

    loss = jax.block_until_ready(
        supcon_loss(feats, labels=labels, compute_dtype=jnp.float32))
    ref = _supcon_loss_ref(feats, labels=labels)
    assert jnp.allclose(loss, ref, rtol=1e-4, atol=1e-5), (loss, ref)

    # SimCLR mode (labels=None, mask=None)
    loss_u = jax.block_until_ready(supcon_loss(feats, compute_dtype=jnp.float32))
    ref_u = _supcon_loss_ref(feats)
    assert jnp.allclose(loss_u, ref_u, rtol=1e-4, atol=1e-5), (loss_u, ref_u)

    # contrast_mode='one'
    loss_o = jax.block_until_ready(
        supcon_loss(feats, labels=labels, contrast_mode='one',
                    compute_dtype=jnp.float32))
    ref_o = _supcon_loss_ref(feats, labels=labels, contrast_mode='one')
    assert jnp.allclose(loss_o, ref_o, rtol=1e-4, atol=1e-5), (loss_o, ref_o)

    # explicit user-provided mask path (int8-streamed tiled mask)
    user_mask = (labels.reshape(-1, 1) == labels.reshape(1, -1)).astype(jnp.float32)
    loss_m = jax.block_until_ready(
        supcon_loss(feats, mask=user_mask, compute_dtype=jnp.float32))
    assert jnp.allclose(loss_m, ref, rtol=1e-4, atol=1e-5), (loss_m, ref)

    # --- medium case exercising the 2-D tiled grid, padding & diag gating -----
    bsz2, nv2, d2 = 288, 2, 64          # A = N = 576 -> grid (2, 2), padded cols
    feats2 = jax.random.normal(k3, (bsz2, nv2, d2), dtype=jnp.float32)
    feats2 = feats2 / jnp.linalg.norm(feats2, axis=-1, keepdims=True)
    labels2 = jax.random.randint(k4, (bsz2,), 0, 10)

    loss2 = jax.block_until_ready(
        supcon_loss(feats2, labels=labels2, compute_dtype=jnp.float32))
    ref2 = _supcon_loss_ref(feats2, labels=labels2)
    assert jnp.allclose(loss2, ref2, rtol=5e-4, atol=1e-4), (loss2, ref2)

    # default compute_dtype (bf16 MXU inputs, f32 accumulation) -> loose tolerance
    loss2_bf16 = jax.block_until_ready(supcon_loss(feats2, labels=labels2))
    assert jnp.allclose(loss2_bf16, ref2, rtol=1e-1, atol=1e-1), (loss2_bf16, ref2)

    print("KERNEL_OK")
</pallas_src>

<mosaic_0001>
module attributes {stable_mosaic.version = 11 : i64} {
  func.func @kernel(%arg0: i32, %arg1: i32, %arg2: memref<8x128xf32, #tpu.memory_space<vmem>>, %arg3: memref<128x128xf32, #tpu.memory_space<vmem>>, %arg4: memref<8x1xi32, #tpu.memory_space<vmem>>, %arg5: memref<1x128xi32, #tpu.memory_space<vmem>>, %arg6: memref<8x1xf32, #tpu.memory_space<vmem>>, %arg7: memref<1x128xf32, #tpu.memory_space<vmem>>, %arg8: memref<8x1xf32, #tpu.memory_space<vmem>>, %arg9: memref<8x1xf32, #tpu.memory_space<vmem>>, %arg10: memref<8x1xf32, #tpu.memory_space<vmem>>, %arg11: memref<8x1xf32, #tpu.memory_space<vmem>>) attributes {dimension_semantics = [#tpu.dimension_semantics<parallel>, #tpu.dimension_semantics<arbitrary>], iteration_bounds = array<i64: 2, 1>, scalar_prefetch = 0 : i64, scratch_operands = 3 : i64, tpu.core_type = #tpu.core_type<tc>, window_params = [{transform_indices = @transform_0, window_bounds = array<i64: 8, 128>}, {transform_indices = @transform_1, window_bounds = array<i64: 128, 128>}, {transform_indices = @transform_2, window_bounds = array<i64: 8, 1>}, {transform_indices = @transform_3, window_bounds = array<i64: 1, 128>}, {transform_indices = @transform_4, window_bounds = array<i64: 8, 1>}, {transform_indices = @transform_5, window_bounds = array<i64: 1, 128>}, {transform_indices = @transform_6, window_bounds = array<i64: 8, 1>}]} {
    %c0_i32 = arith.constant 0 : i32
    %0 = arith.cmpi eq, %arg1, %c0_i32 : i32
    %1 = arith.extui %0 : i1 to i32
    %c0_i32_0 = arith.constant 0 : i32
    %2 = arith.cmpi ne, %1, %c0_i32_0 : i32
    scf.if %2 {
      %cst_31 = arith.constant -1.000000e+30 : f32
      %53 = vector.broadcast %cst_31 : f32 to vector<8x1xf32>
      %c0_32 = arith.constant 0 : index
      %c0_33 = arith.constant 0 : index
      %54 = vector.load %arg9[%c0_32, %c0_33] : memref<8x1xf32, #tpu.memory_space<vmem>>, vector<8x1xf32>
      tpu.vector_store %arg9[%c0_32, %c0_33], %53 {strides = array<i32>} : memref<8x1xf32, #tpu.memory_space<vmem>>, vector<8x1xf32>,
      %cst_34 = arith.constant 0.000000e+00 : f32
      %55 = vector.broadcast %cst_34 : f32 to vector<8x1xf32>
      %c0_35 = arith.constant 0 : index
      %c0_36 = arith.constant 0 : index
      %56 = vector.load %arg10[%c0_35, %c0_36] : memref<8x1xf32, #tpu.memory_space<vmem>>, vector<8x1xf32>
      tpu.vector_store %arg10[%c0_35, %c0_36], %55 {strides = array<i32>} : memref<8x1xf32, #tpu.memory_space<vmem>>, vector<8x1xf32>,
      %cst_37 = arith.constant 0.000000e+00 : f32
      %57 = vector.broadcast %cst_37 : f32 to vector<8x1xf32>
      %c0_38 = arith.constant 0 : index
      %c0_39 = arith.constant 0 : index
      %58 = vector.load %arg11[%c0_38, %c0_39] : memref<8x1xf32, #tpu.memory_space<vmem>>, vector<8x1xf32>
      tpu.vector_store %arg11[%c0_38, %c0_39], %57 {strides = array<i32>} : memref<8x1xf32, #tpu.memory_space<vmem>>, vector<8x1xf32>,
    } else {
    }
    %c0 = arith.constant 0 : index
    %c0_1 = arith.constant 0 : index
    %3 = vector.load %arg2[%c0, %c0_1] : memref<8x128xf32, #tpu.memory_space<vmem>>, vector<8x128xf32>
    %c0_2 = arith.constant 0 : index
    %c0_3 = arith.constant 0 : index
    %4 = vector.load %arg3[%c0_2, %c0_3] : memref<128x128xf32, #tpu.memory_space<vmem>>, vector<128x128xf32>
    %cst = arith.constant dense<0.000000e+00> : vector<8x128xf32>
    %5 = tpu.matmul %3, %4, %cst {dimension_numbers = #tpu.dot_dimension_numbers<[1], [0], [0], [1], [0, 0, 1, 1], [], []>} : vector<8x128xf32>, vector<128x128xf32>, vector<8x128xf32> -> vector<8x128xf32>
    %cst_4 = arith.constant 14.2857141 : f32
    %6 = vector.broadcast %cst_4 : f32 to vector<8x128xf32>
    %7 = arith.mulf %5, %6 : vector<8x128xf32>
    %c0_5 = arith.constant 0 : index
    %c0_6 = arith.constant 0 : index
    %8 = vector.load %arg7[%c0_5, %c0_6] : memref<1x128xf32, #tpu.memory_space<vmem>>, vector<1x128xf32>
    %9 = vector.broadcast %8 : vector<1x128xf32> to vector<8x128xf32>
    %10 = arith.addf %7, %9 : vector<8x128xf32>
    %c0_7 = arith.constant 0 : index
    %c0_8 = arith.constant 0 : index
    %11 = vector.load %arg4[%c0_7, %c0_8] : memref<8x1xi32, #tpu.memory_space<vmem>>, vector<8x1xi32>
    %c0_9 = arith.constant 0 : index
    %c0_10 = arith.constant 0 : index
    %12 = vector.load %arg5[%c0_9, %c0_10] : memref<1x128xi32, #tpu.memory_space<vmem>>, vector<1x128xi32>
    %13 = vector.broadcast %11 : vector<8x1xi32> to vector<8x128xi32>
    %14 = vector.broadcast %12 : vector<1x128xi32> to vector<8x128xi32>
    %15 = arith.cmpi eq, %13, %14 : vector<8x128xi32>
    %16 = arith.extui %15 : vector<8x128xi1> to vector<8x128xi32>
    %17 = arith.sitofp %16 : vector<8x128xi32> to vector<8x128xf32>
    %c8_i32 = arith.constant 8 : i32
    %18 = arith.muli %arg0, %c8_i32 : i32
    %c128_i32 = arith.constant 128 : i32
    %19 = arith.muli %arg1, %c128_i32 : i32
    %c128_i32_11 = arith.constant 128 : i32
    %20 = arith.addi %19, %c128_i32_11 : i32
    %21 = arith.cmpi slt, %18, %20 : i32
    %c8_i32_12 = arith.constant 8 : i32
    %22 = arith.addi %18, %c8_i32_12 : i32
    %23 = arith.cmpi slt, %19, %22 : i32
    %24 = arith.andi %21, %23 : i1
    %25 = arith.extui %24 : i1 to i32
    %c0_i32_13 = arith.constant 0 : i32
    %26 = arith.cmpi ne, %25, %c0_i32_13 : i32
    %27:2 = scf.if %26 -> (vector<8x128xf32>, vector<8x128xf32>) {
      %53 = tpu.iota {dimensions = array<i32: 0>} : vector<8x128xi32>
      %54 = vector.broadcast %18 : i32 to vector<8x128xi32>
      %55 = arith.addi %54, %53 : vector<8x128xi32>
      %56 = tpu.iota {dimensions = array<i32: 1>} : vector<8x128xi32>
      %57 = vector.broadcast %19 : i32 to vector<8x128xi32>
      %58 = arith.addi %57, %56 : vector<8x128xi32>
      %59 = arith.cmpi eq, %55, %58 : vector<8x128xi32>
      %cst_31 = arith.constant -1.000000e+30 : f32
      %60 = vector.broadcast %cst_31 : f32 to vector<8x128xf32>
      %61 = arith.select %59, %60, %10 : vector<8x128xi1>, vector<8x128xf32>
      %cst_32 = arith.constant 0.000000e+00 : f32
      %62 = vector.broadcast %cst_32 : f32 to vector<8x128xf32>
      %63 = arith.select %59, %62, %17 : vector<8x128xi1>, vector<8x128xf32>
      scf.yield %61, %63 : vector<8x128xf32>, vector<8x128xf32>
    } else {
      scf.yield %10, %17 : vector<8x128xf32>, vector<8x128xf32>
    }
    %c0_14 = arith.constant 0 : index
    %c0_15 = arith.constant 0 : index
    %28 = vector.load %arg9[%c0_14, %c0_15] : memref<8x1xf32, #tpu.memory_space<vmem>>, vector<8x1xf32>
    %cst_16 = arith.constant dense<0xFF800000> : vector<8xf32>
    %29 = vector.multi_reduction <maximumf>, %27#0, %cst_16 [1] : vector<8x128xf32> to vector<8xf32>
    %30 = vector.shape_cast %29 : vector<8xf32> to vector<8x1xf32>
    %31 = arith.maximumf %28, %30 : vector<8x1xf32>
    %32 = arith.subf %28, %31 : vector<8x1xf32>
    %33 = math.exp %32 : vector<8x1xf32>
    %34 = vector.broadcast %31 : vector<8x1xf32> to vector<8x128xf32>
    %35 = arith.subf %27#0, %34 : vector<8x128xf32>
    %36 = math.exp %35 : vector<8x128xf32>
    %c0_17 = arith.constant 0 : index
    %c0_18 = arith.constant 0 : index
    %37 = vector.load %arg10[%c0_17, %c0_18] : memref<8x1xf32, #tpu.memory_space<vmem>>, vector<8x1xf32>
    %38 = arith.mulf %33, %37 : vector<8x1xf32>
    %cst_19 = arith.constant dense<0.000000e+00> : vector<8xf32>
    %39 = vector.multi_reduction <add>, %36, %cst_19 [1] : vector<8x128xf32> to vector<8xf32>
    %40 = vector.shape_cast %39 : vector<8xf32> to vector<8x1xf32>
    %41 = arith.addf %38, %40 : vector<8x1xf32>
    %c0_20 = arith.constant 0 : index
    %c0_21 = arith.constant 0 : index
    %42 = vector.load %arg10[%c0_20, %c0_21] : memref<8x1xf32, #tpu.memory_space<vmem>>, vector<8x1xf32>
    tpu.vector_store %arg10[%c0_20, %c0_21], %41 {strides = array<i32>} : memref<8x1xf32, #tpu.memory_space<vmem>>, vector<8x1xf32>,
    %c0_22 = arith.constant 0 : index
    %c0_23 = arith.constant 0 : index
    %43 = vector.load %arg11[%c0_22, %c0_23] : memref<8x1xf32, #tpu.memory_space<vmem>>, vector<8x1xf32>
    %44 = arith.mulf %27#1, %27#0 : vector<8x128xf32>
    %cst_24 = arith.constant dense<0.000000e+00> : vector<8xf32>
    %45 = vector.multi_reduction <add>, %44, %cst_24 [1] : vector<8x128xf32> to vector<8xf32>
    %46 = vector.shape_cast %45 : vector<8xf32> to vector<8x1xf32>
    %47 = arith.addf %43, %46 : vector<8x1xf32>
    %c0_25 = arith.constant 0 : index
    %c0_26 = arith.constant 0 : index
    %48 = vector.load %arg11[%c0_25, %c0_26] : memref<8x1xf32, #tpu.memory_space<vmem>>, vector<8x1xf32>
    tpu.vector_store %arg11[%c0_25, %c0_26], %47 {strides = array<i32>} : memref<8x1xf32, #tpu.memory_space<vmem>>, vector<8x1xf32>,
    %c0_27 = arith.constant 0 : index
    %c0_28 = arith.constant 0 : index
    %49 = vector.load %arg9[%c0_27, %c0_28] : memref<8x1xf32, #tpu.memory_space<vmem>>, vector<8x1xf32>
    tpu.vector_store %arg9[%c0_27, %c0_28], %31 {strides = array<i32>} : memref<8x1xf32, #tpu.memory_space<vmem>>, vector<8x1xf32>,
    %c0_i32_29 = arith.constant 0 : i32
    %50 = arith.cmpi eq, %arg1, %c0_i32_29 : i32
    %51 = arith.extui %50 : i1 to i32
    %c0_i32_30 = arith.constant 0 : i32
    %52 = arith.cmpi ne, %51, %c0_i32_30 : i32
    scf.if %52 {
      %c0_31 = arith.constant 0 : index
      %c0_32 = arith.constant 0 : index
      %53 = vector.load %arg11[%c0_31, %c0_32] : memref<8x1xf32, #tpu.memory_space<vmem>>, vector<8x1xf32>
      %c0_33 = arith.constant 0 : index
      %c0_34 = arith.constant 0 : index
      %54 = vector.load %arg6[%c0_33, %c0_34] : memref<8x1xf32, #tpu.memory_space<vmem>>, vector<8x1xf32>
      %55 = arith.divf %53, %54 : vector<8x1xf32>
      %c0_35 = arith.constant 0 : index
      %c0_36 = arith.constant 0 : index
      %56 = vector.load %arg9[%c0_35, %c0_36] : memref<8x1xf32, #tpu.memory_space<vmem>>, vector<8x1xf32>
      %57 = arith.subf %55, %56 : vector<8x1xf32>
      %c0_37 = arith.constant 0 : index
      %c0_38 = arith.constant 0 : index
      %58 = vector.load %arg10[%c0_37, %c0_38] : memref<8x1xf32, #tpu.memory_space<vmem>>, vector<8x1xf32>
      %59 = math.log %58 : vector<8x1xf32>
      %60 = arith.subf %57, %59 : vector<8x1xf32>
      %cst_39 = arith.constant -1.000000e+00 : f32
      %61 = vector.broadcast %cst_39 : f32 to vector<8x1xf32>
      %62 = arith.mulf %61, %60 : vector<8x1xf32>
      %c0_40 = arith.constant 0 : index
      %c0_41 = arith.constant 0 : index
      %63 = vector.load %arg8[%c0_40, %c0_41] : memref<8x1xf32, #tpu.memory_space<vmem>>, vector<8x1xf32>
      tpu.vector_store %arg8[%c0_40, %c0_41], %62 {strides = array<i32>} : memref<8x1xf32, #tpu.memory_space<vmem>>, vector<8x1xf32>,
    } else {
    }
    return
  }
  func.func @transform_0(%arg0: i32, %arg1: i32) -> (i32, i32) {
    %c0_i32 = arith.constant 0 : i32
    %c0_i32_0 = arith.constant 0 : i32
    return %arg0, %c0_i32 : i32, i32
  }
  func.func @transform_1(%arg0: i32, %arg1: i32) -> (i32, i32) {
    %c0_i32 = arith.constant 0 : i32
    %c0_i32_0 = arith.constant 0 : i32
    return %c0_i32, %arg1 : i32, i32
  }
  func.func @transform_2(%arg0: i32, %arg1: i32) -> (i32, i32) {
    %c0_i32 = arith.constant 0 : i32
    %c0_i32_0 = arith.constant 0 : i32
    return %arg0, %c0_i32 : i32, i32
  }
  func.func @transform_3(%arg0: i32, %arg1: i32) -> (i32, i32) {
    %c0_i32 = arith.constant 0 : i32
    %c0_i32_0 = arith.constant 0 : i32
    return %c0_i32, %arg1 : i32, i32
  }
  func.func @transform_4(%arg0: i32, %arg1: i32) -> (i32, i32) {
    %c0_i32 = arith.constant 0 : i32
    %c0_i32_0 = arith.constant 0 : i32
    return %arg0, %c0_i32 : i32, i32
  }
  func.func @transform_5(%arg0: i32, %arg1: i32) -> (i32, i32) {
    %c0_i32 = arith.constant 0 : i32
    %c0_i32_0 = arith.constant 0 : i32
    return %c0_i32, %arg1 : i32, i32
  }
  func.func @transform_6(%arg0: i32, %arg1: i32) -> (i32, i32) {
    %c0_i32 = arith.constant 0 : i32
    %c0_i32_0 = arith.constant 0 : i32
    return %arg0, %c0_i32 : i32, i32
  }
}

</mosaic_0001>

<bundles_post_ra>
// kernel: tpu_custom_call.1
= control target key start
LH: loop header
LB: loop body
LE: loop exit
PB: predicated region body
PF: predicated region fallthrough
CT: control target
= control target key end

     0   :  { %11 = vsyncpa [#allocation6], 0  ;;  %s893_s21 = smov 0   ;;  %s895_s22 = smov 0   ;;  %s1012_s0 = inlined_call_operand.vmem [shape: f32[16,128], index: 0, kind: input, shape index: {}]   ;;  %s1013_s1 = inlined_call_operand.hbm [shape: f32[128,128], index: 1, kind: input, shape index: {}]   ;;  %s1014_s2 = inlined_call_operand.vmem [shape: s32[16,1], index: 2, kind: input, shape index: {}]   ;;  %s1015_s3 = inlined_call_operand.vmem [shape: s32[1,128], index: 3, kind: input, shape index: {}]   ;;  %s1016_s4 = inlined_call_operand.vmem [shape: f32[16,1], index: 4, kind: input, shape index: {}]   ;;  %s1017_s5 = inlined_call_operand.vmem [shape: f32[1,128], index: 5, kind: input, shape index: {}]   ;;  %s1018_s6 = inlined_call_operand.vmem [shape: f32[16,1], index: 6, kind: output, shape index: {}]  }
   0x1   :  { %s897_s23 = smov 0  }
   0x2 LB: > { %s655_s24 = sadd.s32 4294967295, %s849_s23   ;;  %s29_s25 = sadd.s32 1, %s845_s22  ;;  %s849_s23 = sphi %s897_s23, %s17_s23   ;;  %s845_s22 = sphi %s895_s22, %s1023_s22   ;;  %s841_s21 = sphi %s893_s21, %s1022_s21  }
   0x3   : > { %p31_p0 = scmp.ge.s32.totalorder %s29_s25, 2  ;;  %p657_p1 = scmp.ge.s32.totalorder %s849_s23, 1 }
   0x4   : > { %p216_p2 = scmp.lt.s32.totalorder %s849_s23, 3  ;;  %p918_p4 = scmp.eq.s32.totalorder %s655_s24, 0 }
   0x5   : > { %s1025_s25 = smov (%p31_p0, %s29_s25), 0  ;;  %s851_s28 = smov [#allocation5]  }
   0x6   : > { %p914_p3 = pnand %p657_p1, %p216_p2  ;;  %s230_s29 = sshll.u32 %s851_s28, 4  ;;  %s231_s29 = int_to_ptr.vmem [resolvable:$true] %s230_s29 }
   0x7   : > { %s808_s30 = scalar_lea.vmem %s231_s29, 2048  ;;  %p816_p11 = scmp.lt.s32.totalorder %s231_s29, %s231_s29 }
   0x8   : > { %p748_p5 = pneg %p914_p3  ;;  %p809_p8 = scmp.ne.s32.totalorder %s231_s29, %s808_s30 }
   0x9   : > { %p817_p12 = scmp.lt.s32.totalorder %s808_s30, %s808_s30 }
   0xa   : > { %p749_p6 = pnand %p918_p4, %p748_p5 }
   0xb   : > { %p818_p13 = por %p817_p12, %p816_p11 }
   0xc   : > { %p799_p7 = pneg %p749_p6 }
   0xe   : > { %p811_p9 = pnand %p809_p8, %p799_p7 }
  0x10   : > { %p812_p10 = pneg %p811_p9 }
  0x12   : > { %p819_p0 = pnand %p818_p13, %p812_p10 }
  0x14   : > { %822 = shalt.err (!%p819_p0)
}
  0x15   : > { %s852_s7 = smov 128   ;;  %s853_s8 = smov 8  }
  0x16   : > { %751 = dma.hbm_to_vmem [thread:$0]  (!%p749_p6), %s1013_s1, 2048, %s231_s29, [#allocation6], %s852_s7, %s852_s7, %s853_s8  }
  0x17   : > { %279 = sbr.rel (%p914_p3) target bundleno = 714 (0x2ca), region = 44 }
  0x1c   : > { %836 = dma.done.wait (%p918_p4), [#allocation6], 2048  }
  0x1d   : > { %838 = vsyncadd (%p918_p4), [#allocation6], 4294965248  ;;  %v854_v0 = vmov 0.0   ;;  %vm855_vm0 = vmmov 0   ;;  %p321_p1 = scmp.lt.s32.totalorder %s841_s21, 1  ;;  %v856_v1 = vmov 0   ;;  %v469_v21 = vlaneseq }
  0x1e   : > { %692 = vmatprep.subr.mxu0 %v854_v0  ;;  %724 = vmatprep.mubr.msk.f32.mxu0 %vm855_vm0, %v854_v0  ;;  %v367_v2 = vld [vmem:[#allocation5 + $0x78] sm:$0xff]  ;;  %v366_v3 = vld [vmem:[#allocation5 + $0x70] sm:$0xff]  ;;  %v365_v4 = vld [vmem:[#allocation5 + $0x68] sm:$0xff]  ;;  %s671_s19 = sshll.u32 %s841_s21, 3  ;;  %vm347_vm1 = vcmask 7168  }
  0x1f   : > { %788 = vset.pattern.permute.xlu1 %v856_v1  ;;  %787 = vset.pattern.permute.xlu0 %v856_v1  ;;  %s322_s11 = scalar_select %p321_p1, %s841_s21, 1  ;;  %v364_v5 = vld [vmem:[#allocation5 + $0x60] sm:$0xff]  ;;  %v363_v6 = vld [vmem:[#allocation5 + $0x58] sm:$0xff]  ;;  %v362_v8 = vld [vmem:[#allocation5 + $0x50] sm:$0xff]  ;;  %v857_v20 = vmov -1e+30   ;;  %v471_v23 = vstv %s671_s19 }
  0x20   : > { %693 = vmatpush3.msra.mxu0 %v367_v2  ;;  %v361_v9 = vld [vmem:[#allocation5 + $0x48] sm:$0xff]  ;;  %v360_v10 = vld [vmem:[#allocation5 + $0x40] sm:$0xff]  ;;  %v359_v11 = vld [vmem:[#allocation5 + $0x38] sm:$0xff]  ;;  %s463_s20 = sadd.s32 8, %s671_s19  ;;  %p462_p2 = scmp.lt.s32.totalorder %s671_s19, 128  ;;  %348 = vst.msk [vmem:[#allocation2] sm:$0xff] %vm347_vm1, %v857_v20 }
  0x21   : > { %694 = vmatprep.subr.mxu0 %v854_v0  ;;  %s940_s12 = sshll.u32 %s322_s11, 3  ;;  %v358_v12 = vld [vmem:[#allocation5 + $0x30] sm:$0xff]  ;;  %v357_v13 = vld [vmem:[#allocation5 + $0x28] sm:$0xff]  ;;  %v356_v14 = vld [vmem:[#allocation5 + $0x20] sm:$0xff]  ;;  %p672_p3 = scmp.gt.s32.totalorder %s463_s20, 0  ;;  %349 = vst.msk [vmem:[#allocation3] sm:$0xff] %vm347_vm1, %v854_v0 }
  0x22   : > { %695 = vmatpush3.msra.mxu0 %v366_v3  ;;  %s328_s15 = scalar_lea.vmem %s1014_s2, %s940_s12  ;;  %v355_v15 = vld [vmem:[#allocation5 + $0x18] sm:$0xff]  ;;  %v354_v16 = vld [vmem:[#allocation5 + $0x10] sm:$0xff]  ;;  %v353_v17 = vld [vmem:[#allocation5 + $0x8] sm:$0xff]  ;;  %s324_s18 = scalar_lea.vmem %s1012_s0, %s940_s12  ;;  %350 = vst.msk [vmem:[#allocation4] sm:$0xff] %vm347_vm1, %v854_v0  ;;  %v470_v22 = vshrl.u32 %v469_v21, 7  ;;  %v474_v25 = vand.u32 127, %v469_v21 }
  0x23   : > { %696 = vmatprep.subr.mxu0 %v854_v0  ;;  %v447_v7 = vld [vmem:[%s328_s15] sm:$0xff]  ;;  %v352_v18 = vld [vmem:[#allocation5] sm:$0xff]  ;;  %p965_p4 = pnand %p672_p3, %p462_p2  ;;  %s335_s9 = scalar_lea.vmem %s1016_s4, %s940_s12 }
  0x24   : > { %697 = vmatpush3.msra.mxu0 %v365_v4  ;;  %450 = vperm.xlu1 %788, %v447_v7   ;;  %v351_v19 = vld [vmem:[%s324_s18] sm:$0xff]  ;;  %v472_v24 = vadd.s32 %v471_v23, %v470_v22  ;;  %s342_s13 = scalar_lea.vmem %s1018_s6, %s940_s12 }
  0x25   : > { %698 = vmatprep.subr.mxu0 %v854_v0  ;;  %s754_s21 = scalar_select %p965_p4, 0, 1  ;;  %v668_v27 = vld [vmem:[%s1017_s5] ss:$0 sm:$0xff] }
  0x26   : > { %699 = vmatpush3.msra.mxu0 %v364_v5  ;;  %s740_s26 = scalar_select %p965_p4, 1, 0  ;;  %vm477_vm2 = vcmp.eq.s32.totalorder %v472_v24, %v474_v25  ;;  %v669_v42 = vld [vmem:[%s1015_s3] ss:$0 sm:$0xff] }
  0x27   : > { %700 = vmatprep.subr.mxu0 %v854_v0  ;;  %v733_v28 = vstv %s754_s21  ;;  %v487_v36 = vld [vmem:[#allocation2] sm:$0xff] }
  0x28   : > { %701 = vmatpush3.msra.mxu0 %v363_v6  ;;  %v741_v30 = vstv %s740_s26  ;;  %vm734_vm3 = vcmp.ne.s32.totalorder %v733_v28, 0  ;;  %v502_v53 = vld [vmem:[#allocation3] sm:$0xff]  ;;  %v520_v57 = vld [vmem:[%s335_s9] sm:$0xff] }
  0x29   : > { %702 = vmatprep.subr.mxu0 %v854_v0  ;;  %vm742_vm4 = vcmp.ne.s32.totalorder %v741_v30, 0  ;;  %v509_v58 = vld [vmem:[#allocation4] sm:$0xff] }
  0x2a   : > { %703 = vmatpush3.msra.mxu0 %v362_v8 }
  0x2b   : > { %704 = vmatprep.subr.mxu0 %v854_v0 }
  0x2c   : > { %705 = vmatpush3.msra.mxu0 %v361_v9 }
  0x2d   : > { %706 = vmatprep.subr.mxu0 %v854_v0 }
  0x2e   : > { %707 = vmatpush3.msra.mxu0 %v360_v10 }
  0x2f   : > { %708 = vmatprep.subr.mxu0 %v854_v0 }
  0x30   : > { %709 = vmatpush3.msra.mxu0 %v359_v11 }
  0x31   : > { %710 = vmatprep.subr.mxu0 %v854_v0 }
  0x32   : > { %711 = vmatpush3.msra.mxu0 %v358_v12 }
  0x33   : > { %712 = vmatprep.subr.mxu0 %v854_v0 }
  0x34   : > { %713 = vmatpush3.msra.mxu0 %v357_v13 }
  0x35   : > { %714 = vmatprep.subr.mxu0 %v854_v0 }
  0x36   : > { %715 = vmatpush3.msra.mxu0 %v356_v14 }
  0x37   : > { %716 = vmatprep.subr.mxu0 %v854_v0 }
  0x38   : > { %717 = vmatpush3.msra.mxu0 %v355_v15 }
  0x39   : > { %718 = vmatprep.subr.mxu0 %v854_v0 }
  0x3a   : > { %719 = vmatpush3.msra.mxu0 %v354_v16 }
  0x3b   : > { %720 = vmatprep.subr.mxu0 %v854_v0 }
  0x3c   : > { %721 = vmatpush3.msra.mxu0 %v353_v17 }
  0x3d   : > { %722 = vmatprep.subr.mxu0 %v854_v0 }
  0x3e   : > { %723 = vmatpush3.msra.mxu0 %v352_v18 }
  0x3f   : > { %725 = vmatmul.mubr.f32.vlgmr.msra.gmra.mxu0 %v351_v19 }
  0x9f   : > { %v451_v43 = vpop.permute.xlu1 %450 }
  0xa0   : > { %vm456_vm5 = vcmp.eq.s32.totalorder %v451_v43, %v669_v42 }
  0xa1   : > { %v670_v45 = vsel %vm456_vm5, 1.0, %v854_v0 }
  0xa2   : > { %v479_v46 = vsel %vm477_vm2, 0.0, %v670_v45 }
  0xa3   : > { %v739_v47 = vsel %vm734_vm3, %v479_v46, 0 }
  0xa4   : > { %v747_v49 = vsel %vm742_vm4, %v670_v45, %v739_v47 }
  0xff   : > { %v434_v26 = vpop.f32.mrf.mxu0 }
 0x100   : > { %v438_v29 = vmul.f32 14.285714, %v434_v26 }
 0x101   : > { %v726_v31 = vpop.f32.mrf.mxu0 }
 0x102   : > { %v446_v32 = vadd.f32 %v668_v27, %v438_v29 }
 0x104   : > { %v478_v33 = vsel %vm477_vm2, -1e+30, %v446_v32 }
 0x105   : > { %v735_v34 = vsel %vm734_vm3, %v478_v33, 0 }
 0x106   : > { %v743_v35 = vsel %vm742_vm4, %v446_v32, %v735_v34 }
 0x107   : > { %488 = vmax.xlane.f32.xlu0 %v743_v35  ;;  %v510_v50 = vmul.f32 %v747_v49, %v743_v35 }
 0x190   : > { %v489_v37 = vpop.xlane.xlu0 %488 }
 0x191   : > { %v490_v38 = vmax.f32 %v487_v36, %v489_v37 }
 0x193   : > { %v491_v39 = vsub.f32 %v487_v36, %v490_v38  ;;  %515 = vst.msk [vmem:[#allocation2] sm:$0xff] %vm347_vm1, %v490_v38  ;;  %496 = vperm.xlu0 %787, %v490_v38  }
 0x195   : > { %v492_v51 = vmul.f32 1.442695, %v491_v39 }
 0x19a   : > { %v523_v2 = vld [vmem:[#allocation2] sm:$0xff] }
 0x20e   : > { %v497_v40 = vpop.permute.xlu0 %496 }
 0x20f   : > { %v499_v41 = vsub.f32 %v743_v35, %v497_v40 }
 0x211   : > { %v500_v44 = vmul.f32 1.442695, %v499_v41 }
 0x213   : > { %789 = vpow2.f32 %v500_v44 }
 0x214   : > { %791 = vpow2.f32 %v492_v51 }
 0x215   : > { %793 = vrcp.f32 %v520_v57 }
 0x220   : > { %v790_v48 = vpop.eup %789 }
 0x221   : > { %504 = vadd.xlane.f32.xlu1 %v790_v48  ;;  %v792_v52 = vpop.eup %791 }
 0x222   : > { %v503_v54 = vmul.f32 %v792_v52, %v502_v53  ;;  %v794_v62 = vpop.eup %793 }
 0x225   : > { %511 = vadd.xlane.f32.xlu1 %v510_v50 }
 0x2aa   : > { %v505_v55 = vpop.xlane.xlu1 %504 }
 0x2ab   : > { %v506_v56 = vadd.f32 %v505_v55, %v503_v54 }
 0x2ad   : > { %508 = vst.msk [vmem:[#allocation3] sm:$0xff] %vm347_vm1, %v506_v56 }
 0x2ae   : > { %v512_v59 = vpop.xlane.xlu1 %511 }
 0x2af   : > { %v513_v60 = vadd.f32 %v512_v59, %v509_v58 }
 0x2b1   : > { %514 = vst.msk [vmem:[#allocation4] sm:$0xff] %vm347_vm1, %v513_v60 }
 0x2b4   : > { %v525_v61 = vld [vmem:[#allocation3] sm:$0xff] }
 0x2b5   : > { %795 = vlog2.f32 %v525_v61 }
 0x2b8   : > { %v519_v63 = vld [vmem:[#allocation4] sm:$0xff] }
 0x2b9   : > { %v522_v0 = vmul.f32 %v794_v62, %v519_v63 }
 0x2bb   : > { %v524_v4 = vsub.f32 %v522_v0, %v523_v2 }
 0x2c2   : > { %v796_v1 = vpop.eup %795 }
 0x2c3   : > { %v527_v3 = vmul.f32 0.6931472, %v796_v1 }
 0x2c5   : > { %v528_v5 = vsub.f32 %v524_v4, %v527_v3 }
 0x2c7   : > { %v529_v6 = vmul.f32 -1.0, %v528_v5 }
 0x2c9   : > { %530 = vst.msk [vmem:[%s342_s13] sm:$0xff] %vm347_vm1, %v529_v6 }
 0x2ca PF: > { %s17_s23 = sadd.s32 1, %s849_s23   ;;  %s1022_s21 = smov %s845_s22 }
 0x2cb   : > { %p14_p5 = scmp.ge.s32.totalorder %s17_s23, 4   ;;  %s1023_s22 = smov %s1025_s25 }
 0x2cd   :  { %16 = sbr.rel (!%p14_p5) target bundleno = 2 (0x2), region = 108 }
 0x2d2   :  { %550 = vsyncpa [#allocation6], 1 }
 0x2d3   :  { %552 = vsyncpa [#allocation6 + $0x1], 1 }

</bundles_post_ra>
